<compile_context>
chip_gen: v6e
topology: v6e:2x2x1
jax: 0.10.0
libtpu: 0.0.40
codegen_flags: <defaults>
</compile_context>

<pallas_src>
import functools
import math

import jax
import jax.numpy as jnp
from jax import lax
from jax.experimental import pallas as pl
from jax.experimental.pallas import tpu as pltpu


_NEG_BIG = -1e30  # finite "minus infinity": avoids inf-inf NaNs in online max


def _round_up(x, m):
    return ((x + m - 1) // m) * m


@functools.lru_cache(maxsize=None)
def _vmem_limit_bytes():
    """Generation-aware scoped-VMEM budget (96 MiB on 128 MiB parts, 48 MiB on
    v7x's 64 MiB parts). Conservative fallback if the query is unavailable."""
    cap = 64 * 1024 * 1024
    try:
        cap = int(pltpu.get_tpu_info().vmem_capacity_bytes)
    except Exception:
        pass
    return min((cap // 4) * 3, 96 * 1024 * 1024)


def _compiler_params():
    return pltpu.CompilerParams(
        dimension_semantics=("parallel", "arbitrary"),  # B tiles parallel (megacore),
        vmem_limit_bytes=_vmem_limit_bytes(),           # C tiles carry reductions.
    )


def _pick_tiles(batch, classes, depth):
    """Block shapes must be multiples of (8, 128) or equal to the full dim.
    TB: at least 2 batch tiles when possible (so the parallel axis spans both
    v7x TensorCores), capped at 256.  TC: full C when small, else sized so a
    triple-buffered bf16 weight tile + the f32 logit tile stay well inside the
    generation's VMEM budget."""
    if batch <= 8:
        tb = batch
    else:
        tb = min(256, _round_up(pl.cdiv(batch, 2), 8))
    if classes <= 1024:
        tc = classes
    else:
        vmem = _vmem_limit_bytes()
        per_col = 3 * depth * 2 + tb * 4      # 3x bf16 weight col + f32 logit col
        tc = ((vmem // 2) // per_col) // 128 * 128
        tc = max(128, min(2048, tc))
    return tb, tc


def _weight_spec(shape, index_map, n_stream_steps):
    """Streamed (C-tiled) operand: request 3-deep pipelining when useful so the
    HBM fetch hides behind compute; fall back to default double buffering."""
    if n_stream_steps > 2:
        try:
            return pl.BlockSpec(shape, index_map, pipeline_mode=pl.Buffered(3))
        except Exception:
            pass
    return pl.BlockSpec(shape, index_map)


def _l2_normalize(x, eps=1e-12):
    """F.normalize(p=2, dim=1) semantics: x / max(||x||, eps)."""
    n = jnp.sqrt(jnp.sum(x * x, axis=1, keepdims=True))
    return x / jnp.maximum(n, eps)


# --------------------------------- kernels -----------------------------------


def _target_cosine_kernel(emb_ref, w_ref, lbl_ref, tcos_ref):
    """target_cosine[i] = <embn[i], wn[label[i]]> via a bf16 MXU matmul tile
    with a fused gather; the [TB, TC] cosine tile never leaves VMEM."""
    c = pl.program_id(1)

    @pl.when(c == 0)
    def _():
        tcos_ref[...] = jnp.zeros(tcos_ref.shape, jnp.float32)

    # Contract dim 1 of both operands -> native transposed-RHS vmatmul.
    cos = lax.dot_general(
        emb_ref[...], w_ref[...],
        dimension_numbers=(((1,), (1,)), ((), ())),
        preferred_element_type=jnp.float32)

    tb, tc = cos.shape
    col = lax.broadcasted_iota(jnp.int32, (tb, tc), 1) + c * tc
    is_t = col == lbl_ref[...]                      # (TB, TC) vs (TB, 1)
    tcos_ref[...] += jnp.sum(jnp.where(is_t, cos, 0.0), axis=1, keepdims=True)


def _madacos_stats_kernel(emb_ref, w_ref, lbl_ref, scale_ref,
                          max_ref, sum_ref, *, num_classes):
    """Recompute the cosine tile (bf16 MXU) and stream flash-softmax style
    per-row stats over the non-target columns:
        max_ref[i] = max_{j!=t} scale*cos[i,j]
        sum_ref[i] = sum_{j!=t} exp(scale*cos[i,j] - max_ref[i])"""
    c = pl.program_id(1)

    @pl.when(c == 0)
    def _():
        max_ref[...] = jnp.full(max_ref.shape, _NEG_BIG, jnp.float32)
        sum_ref[...] = jnp.zeros(sum_ref.shape, jnp.float32)

    cos = lax.dot_general(
        emb_ref[...], w_ref[...],
        dimension_numbers=(((1,), (1,)), ((), ())),
        preferred_element_type=jnp.float32)

    scale = scale_ref[0, 0]                         # SMEM scalar
    tb, tc = cos.shape
    col = lax.broadcasted_iota(jnp.int32, (tb, tc), 1) + c * tc
    drop = (col == lbl_ref[...]) | (col >= num_classes)   # target + C-padding
    logits = jnp.where(drop, _NEG_BIG, scale * cos)

    m_prev = max_ref[...]
    m_new = jnp.maximum(m_prev, jnp.max(logits, axis=1, keepdims=True))
    sum_ref[...] = jnp.exp(m_prev - m_new) * sum_ref[...] + jnp.sum(
        jnp.exp(logits - m_new), axis=1, keepdims=True)
    max_ref[...] = m_new


def _aux_ce_kernel(x_ref, w_ref, b_ref, lbl_ref, loss_ref,
                   m_sc, s_sc, t_sc, *, num_classes):
    """Fused auxiliary head: logits = x @ W^T + b streamed over C tiles with an
    online logsumexp + target-logit gather; per-row CE written on last tile."""
    c = pl.program_id(1)

    @pl.when(c == 0)
    def _():
        m_sc[...] = jnp.full(m_sc.shape, _NEG_BIG, jnp.float32)
        s_sc[...] = jnp.zeros(s_sc.shape, jnp.float32)
        t_sc[...] = jnp.zeros(t_sc.shape, jnp.float32)

    logits = lax.dot_general(
        x_ref[...], w_ref[...],
        dimension_numbers=(((1,), (1,)), ((), ())),
        preferred_element_type=jnp.float32) + b_ref[...]

    tb, tc = logits.shape
    col = lax.broadcasted_iota(jnp.int32, (tb, tc), 1) + c * tc
    valid = col < num_classes
    is_t = col == lbl_ref[...]
    masked = jnp.where(valid, logits, _NEG_BIG)

    m_prev = m_sc[...]
    m_new = jnp.maximum(m_prev, jnp.max(masked, axis=1, keepdims=True))
    s_sc[...] = jnp.exp(m_prev - m_new) * s_sc[...] + jnp.sum(
        jnp.exp(masked - m_new), axis=1, keepdims=True)
    m_sc[...] = m_new
    t_sc[...] += jnp.sum(jnp.where(is_t, logits, 0.0), axis=1, keepdims=True)

    @pl.when(c == pl.num_programs(1) - 1)
    def _():
        loss_ref[...] = m_sc[...] + jnp.log(s_sc[...]) - t_sc[...]


# ------------------------------ pallas wrappers -------------------------------


def _target_cosine(embn, wn, labels2d):
    B, D = embn.shape
    C = wn.shape[0]
    TB, TC = _pick_tiles(B, C, D)
    grid = (pl.cdiv(B, TB), pl.cdiv(C, TC))
    return pl.pallas_call(
        _target_cosine_kernel,
        grid=grid,
        in_specs=[
            pl.BlockSpec((TB, D), lambda b, c: (b, 0)),        # embn (bf16, resident)
            _weight_spec((TC, D), lambda b, c: (c, 0), grid[1]),  # wn tile (bf16)
            pl.BlockSpec((TB, 1), lambda b, c: (b, 0)),        # labels
        ],
        out_specs=pl.BlockSpec((TB, 1), lambda b, c: (b, 0)),  # target cosine (resident)
        out_shape=jax.ShapeDtypeStruct((B, 1), jnp.float32),
        compiler_params=_compiler_params(),
    )(embn, wn, labels2d)


def _madacos_stats(embn, wn, labels2d, scale):
    B, D = embn.shape
    C = wn.shape[0]
    TB, TC = _pick_tiles(B, C, D)
    grid = (pl.cdiv(B, TB), pl.cdiv(C, TC))
    scale_arr = jnp.asarray(scale, jnp.float32).reshape(1, 1)
    kernel = functools.partial(_madacos_stats_kernel, num_classes=C)
    return pl.pallas_call(
        kernel,
        grid=grid,
        in_specs=[
            pl.BlockSpec((TB, D), lambda b, c: (b, 0)),        # embn (bf16, resident)
            _weight_spec((TC, D), lambda b, c: (c, 0), grid[1]),  # wn tile (bf16)
            pl.BlockSpec((TB, 1), lambda b, c: (b, 0)),        # labels
            pl.BlockSpec(memory_space=pltpu.MemorySpace.SMEM), # scale scalar
        ],
        out_specs=(
            pl.BlockSpec((TB, 1), lambda b, c: (b, 0)),        # row max (resident)
            pl.BlockSpec((TB, 1), lambda b, c: (b, 0)),        # row exp-sum (resident)
        ),
        out_shape=(
            jax.ShapeDtypeStruct((B, 1), jnp.float32),
            jax.ShapeDtypeStruct((B, 1), jnp.float32),
        ),
        compiler_params=_compiler_params(),
    )(embn, wn, labels2d, scale_arr)


def _aux_linear_ce(x_bf16, w_bf16, bias, labels2d):
    B, D2 = x_bf16.shape
    C = w_bf16.shape[0]
    TB, TC = _pick_tiles(B, C, D2)
    grid = (pl.cdiv(B, TB), pl.cdiv(C, TC))
    kernel = functools.partial(_aux_ce_kernel, num_classes=C)
    return pl.pallas_call(
        kernel,
        grid=grid,
        in_specs=[
            pl.BlockSpec((TB, D2), lambda b, c: (b, 0)),       # aux features (bf16)
            _weight_spec((TC, D2), lambda b, c: (c, 0), grid[1]),  # aux weight (bf16)
            pl.BlockSpec((1, TC), lambda b, c: (0, c)),        # aux bias tile (f32)
            pl.BlockSpec((TB, 1), lambda b, c: (b, 0)),        # labels
        ],
        out_specs=pl.BlockSpec((TB, 1), lambda b, c: (b, 0)),
        out_shape=jax.ShapeDtypeStruct((B, 1), jnp.float32),
        scratch_shapes=[
            pltpu.VMEM((TB, 1), jnp.float32),                  # running max
            pltpu.VMEM((TB, 1), jnp.float32),                  # running exp-sum
            pltpu.VMEM((TB, 1), jnp.float32),                  # target logit
        ],
        compiler_params=_compiler_params(),
    )(x_bf16, w_bf16, bias, labels2d)


# ------------------------------ forward (glue) --------------------------------


def ultron_training_loss(final_features, aux_features, labels, params,
                         rho=0.04, t=0.1, sigma=0.1, aux_weight=0.1):
    B = final_features.shape[0]
    labels2d = labels.astype(jnp.int32).reshape(B, 1)

    # --- MadaCos main loss ---
    # Normalize once (plain JAX, O(B*D) + O(C*D)), cache as bf16 MXU operands.
    embn = _l2_normalize(final_features.astype(jnp.float32)).astype(jnp.bfloat16)
    wn = _l2_normalize(
        params["madacos_weight"].astype(jnp.float32)).astype(jnp.bfloat16)

    # Pass 1: fused target-cosine gather (cosine tile stays in VMEM).
    target_cosine = _target_cosine(embn, wn, labels2d)[:, 0]

    # torch.median returns the lower median for even-length inputs.
    median_cosine = jnp.sort(target_cosine)[(B - 1) // 2]
    scale = math.log((1.0 - t) * (1.0 - rho) / sigma) / (
        1.0 - median_cosine + 1e-8)

    # Pass 2: recompute cosine tiles and stream per-row (max, exp-sum) over the
    # non-target columns at the given scale — no [B, C] HBM round trip.
    row_max, row_sum = _madacos_stats(embn, wn, labels2d, scale)
    m = row_max[:, 0]
    s = row_sum[:, 0]

    mean_cosine = jnp.mean(target_cosine)
    # torch masks the target column to 0 => it contributes exp(0)=1 to exp_sum.
    exp_sum = jnp.mean(jnp.exp(m) * s + 1.0)
    margin = mean_cosine - 0.5 * jnp.log(rho * exp_sum / (1.0 - rho) + 1e-8)
    margin = jnp.clip(margin, 0.0, 1.0)

    # Per-row cross-entropy reconstructed from (m, s, target_cosine).
    t_logit = scale * (target_cosine - margin)
    big = jnp.maximum(t_logit, m)
    lse = big + jnp.log(jnp.exp(t_logit - big) + s * jnp.exp(m - big))
    main_loss = jnp.mean(lse - t_logit)

    # --- auxiliary classifier loss (fully fused linear + CE) ---
    aux_loss = jnp.mean(
        _aux_linear_ce(aux_features.astype(jnp.bfloat16),
                       params["aux_w"].astype(jnp.bfloat16),
                       params["aux_b"], labels2d)[:, 0])

    total_loss = main_loss + aux_weight * aux_loss
    return {"main_loss": main_loss, "aux_loss": aux_loss,
            "total_loss": total_loss}


# ------------------------------ parameter init --------------------------------


def init_params(key, num_classes, embed_dim):
    k1, k2, k3 = jax.random.split(key, 3)
    # xavier_uniform for MadaCos weight [C, D]
    bound = math.sqrt(6.0 / (num_classes + embed_dim))
    madacos_weight = jax.random.uniform(
        k1, (num_classes, embed_dim), jnp.float32, -bound, bound)
    # nn.Linear(embed_dim//2, num_classes)-style init
    d2 = embed_dim // 2
    lim = 1.0 / math.sqrt(d2)
    aux_w = jax.random.uniform(k2, (num_classes, d2), jnp.float32, -lim, lim)
    aux_b = jax.random.uniform(k3, (1, num_classes), jnp.float32, -lim, lim)
    return {"madacos_weight": madacos_weight, "aux_w": aux_w, "aux_b": aux_b}


# ----------------------------------- main --------------------------------------

if __name__ == "__main__":
    B, num_classes, embed_dim = 8, 16, 32

    key = jax.random.PRNGKey(0)
    kp, kf, ka, kl = jax.random.split(key, 4)

    params = init_params(kp, num_classes, embed_dim)
    final_features = jax.random.normal(kf, (B, embed_dim), jnp.float32)
    aux_features = jax.random.normal(ka, (B, embed_dim // 2), jnp.float32)
    labels = jax.random.randint(kl, (B,), 0, num_classes, jnp.int32)

    loss_fn = jax.jit(ultron_training_loss)
    out = loss_fn(final_features, aux_features, labels, params)
    out = jax.tree_util.tree_map(jax.block_until_ready, out)

    for k in ("main_loss", "aux_loss", "total_loss"):
        assert bool(jnp.isfinite(out[k])), f"{k} is not finite"

    print("KERNEL_OK")
</pallas_src>

<mosaic_0001>
module attributes {stable_mosaic.version = 11 : i64} {
  func.func @_target_cosine_kernel(%arg0: i32, %arg1: i32, %arg2: memref<8x32xbf16, #tpu.memory_space<vmem>>, %arg3: memref<16x32xbf16, #tpu.memory_space<vmem>>, %arg4: memref<8x1xi32, #tpu.memory_space<vmem>>, %arg5: memref<8x1xf32, #tpu.memory_space<vmem>>) attributes {dimension_semantics = [#tpu.dimension_semantics<parallel>, #tpu.dimension_semantics<arbitrary>], iteration_bounds = array<i64: 1, 1>, scalar_prefetch = 0 : i64, scratch_operands = 0 : i64, tpu.core_type = #tpu.core_type<tc>, window_params = [{transform_indices = @transform_0, window_bounds = array<i64: 8, 32>}, {transform_indices = @transform_1, window_bounds = array<i64: 16, 32>}, {transform_indices = @transform_2, window_bounds = array<i64: 8, 1>}, {transform_indices = @transform_3, window_bounds = array<i64: 8, 1>}]} {
    %c0_i32 = arith.constant 0 : i32
    %0 = arith.cmpi eq, %arg1, %c0_i32 : i32
    %1 = arith.extui %0 : i1 to i32
    %c0_i32_0 = arith.constant 0 : i32
    %2 = arith.cmpi ne, %1, %c0_i32_0 : i32
    scf.if %2 {
      %cst_12 = arith.constant 0.000000e+00 : f32
      %20 = vector.broadcast %cst_12 : f32 to vector<8x1xf32>
      %c0_13 = arith.constant 0 : index
      %c0_14 = arith.constant 0 : index
      %21 = vector.load %arg5[%c0_13, %c0_14] : memref<8x1xf32, #tpu.memory_space<vmem>>, vector<8x1xf32>
      tpu.vector_store %arg5[%c0_13, %c0_14], %20 {strides = array<i32>} : memref<8x1xf32, #tpu.memory_space<vmem>>, vector<8x1xf32>,
    } else {
    }
    %c0 = arith.constant 0 : index
    %c0_1 = arith.constant 0 : index
    %3 = vector.load %arg2[%c0, %c0_1] : memref<8x32xbf16, #tpu.memory_space<vmem>>, vector<8x32xbf16>
    %c0_2 = arith.constant 0 : index
    %c0_3 = arith.constant 0 : index
    %4 = vector.load %arg3[%c0_2, %c0_3] : memref<16x32xbf16, #tpu.memory_space<vmem>>, vector<16x32xbf16>
    %cst = arith.constant dense<0.000000e+00> : vector<8x16xf32>
    %5 = tpu.matmul %3, %4, %cst {dimension_numbers = #tpu.dot_dimension_numbers<[1], [1], [0], [0], [0, 0, 1, 0], [], []>} : vector<8x32xbf16>, vector<16x32xbf16>, vector<8x16xf32> -> vector<8x16xf32>
    %6 = tpu.iota {dimensions = array<i32: 1>} : vector<8x16xi32>
    %c16_i32 = arith.constant 16 : i32
    %7 = arith.muli %arg1, %c16_i32 : i32
    %8 = vector.broadcast %7 : i32 to vector<8x16xi32>
    %9 = arith.addi %6, %8 : vector<8x16xi32>
    %c0_4 = arith.constant 0 : index
    %c0_5 = arith.constant 0 : index
    %10 = vector.load %arg4[%c0_4, %c0_5] : memref<8x1xi32, #tpu.memory_space<vmem>>, vector<8x1xi32>
    %11 = vector.broadcast %10 : vector<8x1xi32> to vector<8x16xi32>
    %12 = arith.cmpi eq, %9, %11 : vector<8x16xi32>
    %c0_6 = arith.constant 0 : index
    %c0_7 = arith.constant 0 : index
    %13 = vector.load %arg5[%c0_6, %c0_7] : memref<8x1xf32, #tpu.memory_space<vmem>>, vector<8x1xf32>
    %cst_8 = arith.constant 0.000000e+00 : f32
    %14 = vector.broadcast %cst_8 : f32 to vector<8x16xf32>
    %15 = arith.select %12, %5, %14 : vector<8x16xi1>, vector<8x16xf32>
    %cst_9 = arith.constant dense<0.000000e+00> : vector<8xf32>
    %16 = vector.multi_reduction <add>, %15, %cst_9 [1] : vector<8x16xf32> to vector<8xf32>
    %17 = vector.shape_cast %16 : vector<8xf32> to vector<8x1xf32>
    %18 = arith.addf %13, %17 : vector<8x1xf32>
    %c0_10 = arith.constant 0 : index
    %c0_11 = arith.constant 0 : index
    %19 = vector.load %arg5[%c0_10, %c0_11] : memref<8x1xf32, #tpu.memory_space<vmem>>, vector<8x1xf32>
    tpu.vector_store %arg5[%c0_10, %c0_11], %18 {strides = array<i32>} : memref<8x1xf32, #tpu.memory_space<vmem>>, vector<8x1xf32>,
    return
  }
  func.func @transform_0(%arg0: i32, %arg1: i32) -> (i32, i32) {
    %c0_i32 = arith.constant 0 : i32
    %c0_i32_0 = arith.constant 0 : i32
    return %arg0, %c0_i32 : i32, i32
  }
  func.func @transform_1(%arg0: i32, %arg1: i32) -> (i32, i32) {
    %c0_i32 = arith.constant 0 : i32
    %c0_i32_0 = arith.constant 0 : i32
    return %arg1, %c0_i32 : i32, i32
  }
  func.func @transform_2(%arg0: i32, %arg1: i32) -> (i32, i32) {
    %c0_i32 = arith.constant 0 : i32
    %c0_i32_0 = arith.constant 0 : i32
    return %arg0, %c0_i32 : i32, i32
  }
  func.func @transform_3(%arg0: i32, %arg1: i32) -> (i32, i32) {
    %c0_i32 = arith.constant 0 : i32
    %c0_i32_0 = arith.constant 0 : i32
    return %arg0, %c0_i32 : i32, i32
  }
}

module attributes {stable_mosaic.version = 11 : i64} {
  func.func @_madacos_stats_kernel(%arg0: i32, %arg1: i32, %arg2: memref<8x32xbf16, #tpu.memory_space<vmem>>, %arg3: memref<16x32xbf16, #tpu.memory_space<vmem>>, %arg4: memref<8x1xi32, #tpu.memory_space<vmem>>, %arg5: memref<1x1xf32, #tpu.memory_space<smem>>, %arg6: memref<8x1xf32, #tpu.memory_space<vmem>>, %arg7: memref<8x1xf32, #tpu.memory_space<vmem>>) attributes {dimension_semantics = [#tpu.dimension_semantics<parallel>, #tpu.dimension_semantics<arbitrary>], iteration_bounds = array<i64: 1, 1>, scalar_prefetch = 0 : i64, scratch_operands = 0 : i64, tpu.core_type = #tpu.core_type<tc>, window_params = [{transform_indices = @transform_0, window_bounds = array<i64: 8, 32>}, {transform_indices = @transform_1, window_bounds = array<i64: 16, 32>}, {transform_indices = @transform_2, window_bounds = array<i64: 8, 1>}, {transform_indices = @transform_3, window_bounds = array<i64: 1, 1>}, {transform_indices = @transform_4, window_bounds = array<i64: 8, 1>}, {transform_indices = @transform_5, window_bounds = array<i64: 8, 1>}]} {
    %c0_i32 = arith.constant 0 : i32
    %0 = arith.cmpi eq, %arg1, %c0_i32 : i32
    %1 = arith.extui %0 : i1 to i32
    %c0_i32_0 = arith.constant 0 : i32
    %2 = arith.cmpi ne, %1, %c0_i32_0 : i32
    scf.if %2 {
      %cst_20 = arith.constant -1.000000e+30 : f32
      %37 = vector.broadcast %cst_20 : f32 to vector<8x1xf32>
      %c0_21 = arith.constant 0 : index
      %c0_22 = arith.constant 0 : index
      %38 = vector.load %arg6[%c0_21, %c0_22] : memref<8x1xf32, #tpu.memory_space<vmem>>, vector<8x1xf32>
      tpu.vector_store %arg6[%c0_21, %c0_22], %37 {strides = array<i32>} : memref<8x1xf32, #tpu.memory_space<vmem>>, vector<8x1xf32>,
      %cst_23 = arith.constant 0.000000e+00 : f32
      %39 = vector.broadcast %cst_23 : f32 to vector<8x1xf32>
      %c0_24 = arith.constant 0 : index
      %c0_25 = arith.constant 0 : index
      %40 = vector.load %arg7[%c0_24, %c0_25] : memref<8x1xf32, #tpu.memory_space<vmem>>, vector<8x1xf32>
      tpu.vector_store %arg7[%c0_24, %c0_25], %39 {strides = array<i32>} : memref<8x1xf32, #tpu.memory_space<vmem>>, vector<8x1xf32>,
    } else {
    }
    %c0 = arith.constant 0 : index
    %c0_1 = arith.constant 0 : index
    %3 = vector.load %arg2[%c0, %c0_1] : memref<8x32xbf16, #tpu.memory_space<vmem>>, vector<8x32xbf16>
    %c0_2 = arith.constant 0 : index
    %c0_3 = arith.constant 0 : index
    %4 = vector.load %arg3[%c0_2, %c0_3] : memref<16x32xbf16, #tpu.memory_space<vmem>>, vector<16x32xbf16>
    %cst = arith.constant dense<0.000000e+00> : vector<8x16xf32>
    %5 = tpu.matmul %3, %4, %cst {dimension_numbers = #tpu.dot_dimension_numbers<[1], [1], [0], [0], [0, 0, 1, 0], [], []>} : vector<8x32xbf16>, vector<16x32xbf16>, vector<8x16xf32> -> vector<8x16xf32>
    %c0_4 = arith.constant 0 : index
    %c0_5 = arith.constant 0 : index
    %6 = memref.load %arg5[%c0_4, %c0_5] : memref<1x1xf32, #tpu.memory_space<smem>>
    %7 = tpu.iota {dimensions = array<i32: 1>} : vector<8x16xi32>
    %c16_i32 = arith.constant 16 : i32
    %8 = arith.muli %arg1, %c16_i32 : i32
    %9 = vector.broadcast %8 : i32 to vector<8x16xi32>
    %10 = arith.addi %7, %9 : vector<8x16xi32>
    %c0_6 = arith.constant 0 : index
    %c0_7 = arith.constant 0 : index
    %11 = vector.load %arg4[%c0_6, %c0_7] : memref<8x1xi32, #tpu.memory_space<vmem>>, vector<8x1xi32>
    %12 = vector.broadcast %11 : vector<8x1xi32> to vector<8x16xi32>
    %13 = arith.cmpi eq, %10, %12 : vector<8x16xi32>
    %c16_i32_8 = arith.constant 16 : i32
    %14 = vector.broadcast %c16_i32_8 : i32 to vector<8x16xi32>
    %15 = arith.cmpi sge, %10, %14 : vector<8x16xi32>
    %16 = arith.ori %13, %15 : vector<8x16xi1>
    %17 = vector.broadcast %6 : f32 to vector<8x16xf32>
    %18 = arith.mulf %17, %5 : vector<8x16xf32>
    %cst_9 = arith.constant -1.000000e+30 : f32
    %19 = vector.broadcast %cst_9 : f32 to vector<8x16xf32>
    %20 = arith.select %16, %19, %18 : vector<8x16xi1>, vector<8x16xf32>
    %c0_10 = arith.constant 0 : index
    %c0_11 = arith.constant 0 : index
    %21 = vector.load %arg6[%c0_10, %c0_11] : memref<8x1xf32, #tpu.memory_space<vmem>>, vector<8x1xf32>
    %cst_12 = arith.constant dense<0xFF800000> : vector<8xf32>
    %22 = vector.multi_reduction <maximumf>, %20, %cst_12 [1] : vector<8x16xf32> to vector<8xf32>
    %23 = vector.shape_cast %22 : vector<8xf32> to vector<8x1xf32>
    %24 = arith.maximumf %21, %23 : vector<8x1xf32>
    %25 = arith.subf %21, %24 : vector<8x1xf32>
    %26 = math.exp %25 : vector<8x1xf32>
    %c0_13 = arith.constant 0 : index
    %c0_14 = arith.constant 0 : index
    %27 = vector.load %arg7[%c0_13, %c0_14] : memref<8x1xf32, #tpu.memory_space<vmem>>, vector<8x1xf32>
    %28 = arith.mulf %26, %27 : vector<8x1xf32>
    %29 = vector.broadcast %24 : vector<8x1xf32> to vector<8x16xf32>
    %30 = arith.subf %20, %29 : vector<8x16xf32>
    %31 = math.exp %30 : vector<8x16xf32>
    %cst_15 = arith.constant dense<0.000000e+00> : vector<8xf32>
    %32 = vector.multi_reduction <add>, %31, %cst_15 [1] : vector<8x16xf32> to vector<8xf32>
    %33 = vector.shape_cast %32 : vector<8xf32> to vector<8x1xf32>
    %34 = arith.addf %28, %33 : vector<8x1xf32>
    %c0_16 = arith.constant 0 : index
    %c0_17 = arith.constant 0 : index
    %35 = vector.load %arg7[%c0_16, %c0_17] : memref<8x1xf32, #tpu.memory_space<vmem>>, vector<8x1xf32>
    tpu.vector_store %arg7[%c0_16, %c0_17], %34 {strides = array<i32>} : memref<8x1xf32, #tpu.memory_space<vmem>>, vector<8x1xf32>,
    %c0_18 = arith.constant 0 : index
    %c0_19 = arith.constant 0 : index
    %36 = vector.load %arg6[%c0_18, %c0_19] : memref<8x1xf32, #tpu.memory_space<vmem>>, vector<8x1xf32>
    tpu.vector_store %arg6[%c0_18, %c0_19], %24 {strides = array<i32>} : memref<8x1xf32, #tpu.memory_space<vmem>>, vector<8x1xf32>,
    return
  }
  func.func @transform_0(%arg0: i32, %arg1: i32) -> (i32, i32) {
    %c0_i32 = arith.constant 0 : i32
    %c0_i32_0 = arith.constant 0 : i32
    return %arg0, %c0_i32 : i32, i32
  }
  func.func @transform_1(%arg0: i32, %arg1: i32) -> (i32, i32) {
    %c0_i32 = arith.constant 0 : i32
    %c0_i32_0 = arith.constant 0 : i32
    return %arg1, %c0_i32 : i32, i32
  }
  func.func @transform_2(%arg0: i32, %arg1: i32) -> (i32, i32) {
    %c0_i32 = arith.constant 0 : i32
    %c0_i32_0 = arith.constant 0 : i32
    return %arg0, %c0_i32 : i32, i32
  }
  func.func @transform_3(%arg0: i32, %arg1: i32) -> (i32, i32) {
    %c0_i32 = arith.constant 0 : i32
    %c0_i32_0 = arith.constant 0 : i32
    %c0_i32_1 = arith.constant 0 : i32
    return %c0_i32, %c0_i32_0 : i32, i32
  }
  func.func @transform_4(%arg0: i32, %arg1: i32) -> (i32, i32) {
    %c0_i32 = arith.constant 0 : i32
    %c0_i32_0 = arith.constant 0 : i32
    return %arg0, %c0_i32 : i32, i32
  }
  func.func @transform_5(%arg0: i32, %arg1: i32) -> (i32, i32) {
    %c0_i32 = arith.constant 0 : i32
    %c0_i32_0 = arith.constant 0 : i32
    return %arg0, %c0_i32 : i32, i32
  }
}

module attributes {stable_mosaic.version = 11 : i64} {
  func.func @_aux_ce_kernel(%arg0: i32, %arg1: i32, %arg2: memref<8x16xbf16, #tpu.memory_space<vmem>>, %arg3: memref<16x16xbf16, #tpu.memory_space<vmem>>, %arg4: memref<1x16xf32, #tpu.memory_space<vmem>>, %arg5: memref<8x1xi32, #tpu.memory_space<vmem>>, %arg6: memref<8x1xf32, #tpu.memory_space<vmem>>, %arg7: memref<8x1xf32, #tpu.memory_space<vmem>>, %arg8: memref<8x1xf32, #tpu.memory_space<vmem>>, %arg9: memref<8x1xf32, #tpu.memory_space<vmem>>) attributes {dimension_semantics = [#tpu.dimension_semantics<parallel>, #tpu.dimension_semantics<arbitrary>], iteration_bounds = array<i64: 1, 1>, scalar_prefetch = 0 : i64, scratch_operands = 3 : i64, tpu.core_type = #tpu.core_type<tc>, window_params = [{transform_indices = @transform_0, window_bounds = array<i64: 8, 16>}, {transform_indices = @transform_1, window_bounds = array<i64: 16, 16>}, {transform_indices = @transform_2, window_bounds = array<i64: 1, 16>}, {transform_indices = @transform_3, window_bounds = array<i64: 8, 1>}, {transform_indices = @transform_4, window_bounds = array<i64: 8, 1>}]} {
    %c0_i32 = arith.constant 0 : i32
    %0 = arith.cmpi eq, %arg1, %c0_i32 : i32
    %1 = arith.extui %0 : i1 to i32
    %c0_i32_0 = arith.constant 0 : i32
    %2 = arith.cmpi ne, %1, %c0_i32_0 : i32
    scf.if %2 {
      %cst_28 = arith.constant -1.000000e+30 : f32
      %46 = vector.broadcast %cst_28 : f32 to vector<8x1xf32>
      %c0_29 = arith.constant 0 : index
      %c0_30 = arith.constant 0 : index
      %47 = vector.load %arg7[%c0_29, %c0_30] : memref<8x1xf32, #tpu.memory_space<vmem>>, vector<8x1xf32>
      tpu.vector_store %arg7[%c0_29, %c0_30], %46 {strides = array<i32>} : memref<8x1xf32, #tpu.memory_space<vmem>>, vector<8x1xf32>,
      %cst_31 = arith.constant 0.000000e+00 : f32
      %48 = vector.broadcast %cst_31 : f32 to vector<8x1xf32>
      %c0_32 = arith.constant 0 : index
      %c0_33 = arith.constant 0 : index
      %49 = vector.load %arg8[%c0_32, %c0_33] : memref<8x1xf32, #tpu.memory_space<vmem>>, vector<8x1xf32>
      tpu.vector_store %arg8[%c0_32, %c0_33], %48 {strides = array<i32>} : memref<8x1xf32, #tpu.memory_space<vmem>>, vector<8x1xf32>,
      %cst_34 = arith.constant 0.000000e+00 : f32
      %50 = vector.broadcast %cst_34 : f32 to vector<8x1xf32>
      %c0_35 = arith.constant 0 : index
      %c0_36 = arith.constant 0 : index
      %51 = vector.load %arg9[%c0_35, %c0_36] : memref<8x1xf32, #tpu.memory_space<vmem>>, vector<8x1xf32>
      tpu.vector_store %arg9[%c0_35, %c0_36], %50 {strides = array<i32>} : memref<8x1xf32, #tpu.memory_space<vmem>>, vector<8x1xf32>,
    } else {
    }
    %c0 = arith.constant 0 : index
    %c0_1 = arith.constant 0 : index
    %3 = vector.load %arg2[%c0, %c0_1] : memref<8x16xbf16, #tpu.memory_space<vmem>>, vector<8x16xbf16>
    %c0_2 = arith.constant 0 : index
    %c0_3 = arith.constant 0 : index
    %4 = vector.load %arg3[%c0_2, %c0_3] : memref<16x16xbf16, #tpu.memory_space<vmem>>, vector<16x16xbf16>
    %cst = arith.constant dense<0.000000e+00> : vector<8x16xf32>
    %5 = tpu.matmul %3, %4, %cst {dimension_numbers = #tpu.dot_dimension_numbers<[1], [1], [0], [0], [0, 0, 1, 0], [], []>} : vector<8x16xbf16>, vector<16x16xbf16>, vector<8x16xf32> -> vector<8x16xf32>
    %c0_4 = arith.constant 0 : index
    %c0_5 = arith.constant 0 : index
    %6 = vector.load %arg4[%c0_4, %c0_5] : memref<1x16xf32, #tpu.memory_space<vmem>>, vector<1x16xf32>
    %7 = vector.broadcast %6 : vector<1x16xf32> to vector<8x16xf32>
    %8 = arith.addf %5, %7 : vector<8x16xf32>
    %9 = tpu.iota {dimensions = array<i32: 1>} : vector<8x16xi32>
    %c16_i32 = arith.constant 16 : i32
    %10 = arith.muli %arg1, %c16_i32 : i32
    %11 = vector.broadcast %10 : i32 to vector<8x16xi32>
    %12 = arith.addi %9, %11 : vector<8x16xi32>
    %c16_i32_6 = arith.constant 16 : i32
    %13 = vector.broadcast %c16_i32_6 : i32 to vector<8x16xi32>
    %14 = arith.cmpi slt, %12, %13 : vector<8x16xi32>
    %c0_7 = arith.constant 0 : index
    %c0_8 = arith.constant 0 : index
    %15 = vector.load %arg5[%c0_7, %c0_8] : memref<8x1xi32, #tpu.memory_space<vmem>>, vector<8x1xi32>
    %16 = vector.broadcast %15 : vector<8x1xi32> to vector<8x16xi32>
    %17 = arith.cmpi eq, %12, %16 : vector<8x16xi32>
    %cst_9 = arith.constant -1.000000e+30 : f32
    %18 = vector.broadcast %cst_9 : f32 to vector<8x16xf32>
    %19 = arith.select %14, %8, %18 : vector<8x16xi1>, vector<8x16xf32>
    %c0_10 = arith.constant 0 : index
    %c0_11 = arith.constant 0 : index
    %20 = vector.load %arg7[%c0_10, %c0_11] : memref<8x1xf32, #tpu.memory_space<vmem>>, vector<8x1xf32>
    %cst_12 = arith.constant dense<0xFF800000> : vector<8xf32>
    %21 = vector.multi_reduction <maximumf>, %19, %cst_12 [1] : vector<8x16xf32> to vector<8xf32>
    %22 = vector.shape_cast %21 : vector<8xf32> to vector<8x1xf32>
    %23 = arith.maximumf %20, %22 : vector<8x1xf32>
    %24 = arith.subf %20, %23 : vector<8x1xf32>
    %25 = math.exp %24 : vector<8x1xf32>
    %c0_13 = arith.constant 0 : index
    %c0_14 = arith.constant 0 : index
    %26 = vector.load %arg8[%c0_13, %c0_14] : memref<8x1xf32, #tpu.memory_space<vmem>>, vector<8x1xf32>
    %27 = arith.mulf %25, %26 : vector<8x1xf32>
    %28 = vector.broadcast %23 : vector<8x1xf32> to vector<8x16xf32>
    %29 = arith.subf %19, %28 : vector<8x16xf32>
    %30 = math.exp %29 : vector<8x16xf32>
    %cst_15 = arith.constant dense<0.000000e+00> : vector<8xf32>
    %31 = vector.multi_reduction <add>, %30, %cst_15 [1] : vector<8x16xf32> to vector<8xf32>
    %32 = vector.shape_cast %31 : vector<8xf32> to vector<8x1xf32>
    %33 = arith.addf %27, %32 : vector<8x1xf32>
    %c0_16 = arith.constant 0 : index
    %c0_17 = arith.constant 0 : index
    %34 = vector.load %arg8[%c0_16, %c0_17] : memref<8x1xf32, #tpu.memory_space<vmem>>, vector<8x1xf32>
    tpu.vector_store %arg8[%c0_16, %c0_17], %33 {strides = array<i32>} : memref<8x1xf32, #tpu.memory_space<vmem>>, vector<8x1xf32>,
    %c0_18 = arith.constant 0 : index
    %c0_19 = arith.constant 0 : index
    %35 = vector.load %arg7[%c0_18, %c0_19] : memref<8x1xf32, #tpu.memory_space<vmem>>, vector<8x1xf32>
    tpu.vector_store %arg7[%c0_18, %c0_19], %23 {strides = array<i32>} : memref<8x1xf32, #tpu.memory_space<vmem>>, vector<8x1xf32>,
    %c0_20 = arith.constant 0 : index
    %c0_21 = arith.constant 0 : index
    %36 = vector.load %arg9[%c0_20, %c0_21] : memref<8x1xf32, #tpu.memory_space<vmem>>, vector<8x1xf32>
    %cst_22 = arith.constant 0.000000e+00 : f32
    %37 = vector.broadcast %cst_22 : f32 to vector<8x16xf32>
    %38 = arith.select %17, %8, %37 : vector<8x16xi1>, vector<8x16xf32>
    %cst_23 = arith.constant dense<0.000000e+00> : vector<8xf32>
    %39 = vector.multi_reduction <add>, %38, %cst_23 [1] : vector<8x16xf32> to vector<8xf32>
    %40 = vector.shape_cast %39 : vector<8xf32> to vector<8x1xf32>
    %41 = arith.addf %36, %40 : vector<8x1xf32>
    %c0_24 = arith.constant 0 : index
    %c0_25 = arith.constant 0 : index
    %42 = vector.load %arg9[%c0_24, %c0_25] : memref<8x1xf32, #tpu.memory_space<vmem>>, vector<8x1xf32>
    tpu.vector_store %arg9[%c0_24, %c0_25], %41 {strides = array<i32>} : memref<8x1xf32, #tpu.memory_space<vmem>>, vector<8x1xf32>,
    %c0_i32_26 = arith.constant 0 : i32
    %43 = arith.cmpi eq, %arg1, %c0_i32_26 : i32
    %44 = arith.extui %43 : i1 to i32
    %c0_i32_27 = arith.constant 0 : i32
    %45 = arith.cmpi ne, %44, %c0_i32_27 : i32
    scf.if %45 {
      %c0_28 = arith.constant 0 : index
      %c0_29 = arith.constant 0 : index
      %46 = vector.load %arg7[%c0_28, %c0_29] : memref<8x1xf32, #tpu.memory_space<vmem>>, vector<8x1xf32>
      %c0_30 = arith.constant 0 : index
      %c0_31 = arith.constant 0 : index
      %47 = vector.load %arg8[%c0_30, %c0_31] : memref<8x1xf32, #tpu.memory_space<vmem>>, vector<8x1xf32>
      %48 = math.log %47 : vector<8x1xf32>
      %49 = arith.addf %46, %48 : vector<8x1xf32>
      %c0_32 = arith.constant 0 : index
      %c0_33 = arith.constant 0 : index
      %50 = vector.load %arg9[%c0_32, %c0_33] : memref<8x1xf32, #tpu.memory_space<vmem>>, vector<8x1xf32>
      %51 = arith.subf %49, %50 : vector<8x1xf32>
      %c0_34 = arith.constant 0 : index
      %c0_35 = arith.constant 0 : index
      %52 = vector.load %arg6[%c0_34, %c0_35] : memref<8x1xf32, #tpu.memory_space<vmem>>, vector<8x1xf32>
      tpu.vector_store %arg6[%c0_34, %c0_35], %51 {strides = array<i32>} : memref<8x1xf32, #tpu.memory_space<vmem>>, vector<8x1xf32>,
    } else {
    }
    return
  }
  func.func @transform_0(%arg0: i32, %arg1: i32) -> (i32, i32) {
    %c0_i32 = arith.constant 0 : i32
    %c0_i32_0 = arith.constant 0 : i32
    return %arg0, %c0_i32 : i32, i32
  }
  func.func @transform_1(%arg0: i32, %arg1: i32) -> (i32, i32) {
    %c0_i32 = arith.constant 0 : i32
    %c0_i32_0 = arith.constant 0 : i32
    return %arg1, %c0_i32 : i32, i32
  }
  func.func @transform_2(%arg0: i32, %arg1: i32) -> (i32, i32) {
    %c0_i32 = arith.constant 0 : i32
    %c0_i32_0 = arith.constant 0 : i32
    return %c0_i32, %arg1 : i32, i32
  }
  func.func @transform_3(%arg0: i32, %arg1: i32) -> (i32, i32) {
    %c0_i32 = arith.constant 0 : i32
    %c0_i32_0 = arith.constant 0 : i32
    return %arg0, %c0_i32 : i32, i32
  }
  func.func @transform_4(%arg0: i32, %arg1: i32) -> (i32, i32) {
    %c0_i32 = arith.constant 0 : i32
    %c0_i32_0 = arith.constant 0 : i32
    return %arg0, %c0_i32 : i32, i32
  }
}

</mosaic_0001>

<bundles_post_ra>
// kernel: ultron_training_loss.3
= control target key start
LH: loop header
LB: loop body
LE: loop exit
PB: predicated region body
PF: predicated region fallthrough
CT: control target
= control target key end

     0   :  { %vm29_vm0 = vcmask 261120   ;;  %v114_v0 = vmov 0.0   ;;  %vm115_vm1 = vmmov 0   ;;  %v116_v2 = vmov 0   ;;  %s157_s1 = inlined_call_operand.vmem [shape: bf16[16,32], index: 1, kind: input, shape index: {}]   ;;  %s158_s2 = inlined_call_operand.vmem [shape: s32[8,1], index: 2, kind: input, shape index: {}]   ;;  %s159_s0 = inlined_call_operand.vmem [shape: bf16[8,32], index: 0, kind: input, shape index: {}]   ;;  %s160_s3 = inlined_call_operand.vmem [shape: f32[8,1], index: 3, kind: output, shape index: {}]  }
   0x1   :  { %103 = vmatprep.subr.bf16.mxu0 %v114_v0  ;;  %v113_v1 = vld [vmem:[%s157_s1] sm:$0xff]   ;;  %105 = vmatprep.mubr.msk.bf16.mxu0 %vm115_vm1, %v114_v0  ;;  %vm19_vm2 = vcmask 7168   ;;  %v76_v6 = vlaneseq  ;;  %vm88_vm4 = vcmask 130048  }
   0x2   :  { %112 = vset.pattern.permute.xlu0 %v116_v2  ;;  %v81_v3 = vld [vmem:[%s158_s2] sm:$0xff]  ;;  %v34_v4 = vsel %vm29_vm0, %v113_v1, 0  ;;  %20 = vst.msk [vmem:[%s160_s3] sm:$0xff] %vm19_vm2, %v114_v0 }
   0x3   :  { %83 = vperm.xlu0 %112, %v81_v3   ;;  %104 = vmatpush3.bf16.xpose.msra.mxu0 %v34_v4  ;;  %v21_v5 = vld [vmem:[%s159_s0] sm:$0xf]  ;;  %v77_v7 = vand.u32 127, %v76_v6 }
   0x9   :  { %v86_v15 = vld [vmem:[%s160_s3] sm:$0xff] }
   0xa   :  { %106 = vmatmul.mubr.msk.bf16.vlgmr.msra.gmra.mxu0 %vm29_vm0, %v21_v5 }
  0x7e   :  { %v84_v8 = vpop.permute.xlu0 %83 }
  0x7f   :  { %vm85_vm3 = vcmp.eq.s32.totalorder %v77_v7, %v84_v8 }
  0xca   :  { %v70_v9 = vpop.f32.mrf.mxu0 }
  0xcb   :  { %v87_v10 = vsel %vm85_vm3, %v70_v9, 0.0 }
  0xcc   :  { %v107_v11 = vpop.f32.mrf.mxu0  ;;  %v89_v12 = vsel %vm88_vm4, %v87_v10, 0.0 }
  0xcd   :  { %90 = vadd.xlane.f32.xlu0 %v89_v12 }
  0xce   :  { %v73_v13 = vpop.f32.mrf.mxu0 }
  0xd0   :  { %v108_v14 = vpop.f32.mrf.mxu0 }
 0x156   :  { %v91_v16 = vpop.xlane.xlu0 %90 }
 0x157   :  { %v92_v17 = vadd.f32 %v91_v16, %v86_v15 }
 0x159   :  { %94 = vst.msk [vmem:[%s160_s3] sm:$0xff] %vm19_vm2, %v92_v17 }

// kernel: ultron_training_loss.4
= control target key start
LH: loop header
LB: loop body
LE: loop exit
PB: predicated region body
PF: predicated region fallthrough
CT: control target
= control target key end

     0   :  { %vm25_vm0 = vcmask 7168   ;;  %vm36_vm1 = vcmask 261120   ;;  %v154_v0 = vmov 0.0   ;;  %vm155_vm2 = vmmov 0   ;;  %s226_s5 = inlined_call_operand.vmem [shape: f32[8,1], index: 5, kind: output, shape index: {1}]   ;;  %s227_s1 = inlined_call_operand.vmem [shape: bf16[16,32], index: 1, kind: input, shape index: {}]   ;;  %s228_s2 = inlined_call_operand.vmem [shape: s32[8,1], index: 2, kind: input, shape index: {}]   ;;  %s229_s0 = inlined_call_operand.vmem [shape: bf16[8,32], index: 0, kind: input, shape index: {}]   ;;  %s230_s4 = inlined_call_operand.vmem [shape: f32[8,1], index: 4, kind: output, shape index: {0}]   ;;  %s231_s3 = inlined_call_operand.<no memory space> [shape: f32[1,1], index: 3, kind: input, shape index: {}]  }
   0x1   :  { %27 = vst.msk [vmem:[%s226_s5] sm:$0xff] %vm25_vm0, %v154_v0  ;;  %137 = vmatprep.subr.bf16.mxu0 %v154_v0  ;;  %v149_v1 = vld [vmem:[%s227_s1] sm:$0xff]   ;;  %139 = vmatprep.mubr.msk.bf16.mxu0 %vm155_vm2, %v154_v0  ;;  %v156_v2 = vmov 0   ;;  %v157_v6 = vmov -1e+30   ;;  %v84_v7 = vlaneseq  ;;  %v96_v10 = vstv %s231_s3 }
   0x2   :  { %147 = vset.pattern.permute.xlu0 %v156_v2  ;;  %v89_v3 = vld [vmem:[%s228_s2] sm:$0xff]  ;;  %148 = vset.pattern.permute.xlu1 %v156_v2  ;;  %v41_v4 = vsel %vm36_vm1, %v149_v1, 0  ;;  %26 = vst.msk [vmem:[%s230_s4] sm:$0xff] %vm25_vm0, %v157_v6  ;;  %vm100_vm6 = vcmask 130048  }
   0x3   :  { %91 = vperm.xlu0 %147, %v89_v3   ;;  %138 = vmatpush3.bf16.xpose.msra.mxu0 %v41_v4  ;;  %v28_v5 = vld [vmem:[%s229_s0] sm:$0xf]  ;;  %v85_v8 = vand.u32 127, %v84_v7 }
   0x5   :  { %vm94_vm3 = vcmp.ge.s32.totalorder %v85_v8, 16 }
   0x8   :  { %v108_v29 = vld [vmem:[%s226_s5] sm:$0xff] }
   0x9   :  { %v99_v18 = vld [vmem:[%s230_s4] sm:$0xff] }
   0xa   :  { %140 = vmatmul.mubr.msk.bf16.vlgmr.msra.gmra.mxu0 %vm36_vm1, %v28_v5 }
  0x7e   :  { %v92_v9 = vpop.permute.xlu0 %91 }
  0x7f   :  { %vm93_vm4 = vcmp.eq.s32.totalorder %v85_v8, %v92_v9 }
  0x80   :  { %vm95_vm5 = vmor %vm93_vm4, %vm94_vm3 }
  0xca   :  { %v77_v11 = vpop.f32.mrf.mxu0 }
  0xcb   :  { %v97_v12 = vmul.f32 %v96_v10, %v77_v11 }
  0xcc   :  { %v141_v13 = vpop.f32.mrf.mxu0 }
  0xcd   :  { %v98_v14 = vsel %vm95_vm5, -1e+30, %v97_v12 }
  0xce   :  { %v80_v15 = vpop.f32.mrf.mxu0  ;;  %v101_v16 = vsel %vm100_vm6, %v98_v14, -inf }
  0xcf   :  { %102 = vmax.xlane.f32.xlu0 %v101_v16 }
  0xd0   :  { %v142_v17 = vpop.f32.mrf.mxu0 }
 0x158   :  { %v103_v19 = vpop.xlane.xlu0 %102 }
 0x159   :  { %v104_v20 = vmax.f32 %v99_v18, %v103_v19 }
 0x15b   :  { %v105_v21 = vsub.f32 %v99_v18, %v104_v20  ;;  %124 = vst.msk [vmem:[%s230_s4] sm:$0xff] %vm25_vm0, %v104_v20  ;;  %112 = vperm.xlu1 %148, %v104_v20  }
 0x15d   :  { %v106_v27 = vmul.f32 1.442695, %v105_v21 }
 0x1d6   :  { %v113_v22 = vpop.permute.xlu1 %112 }
 0x1d7   :  { %v115_v23 = vsub.f32 %v98_v14, %v113_v22 }
 0x1d9   :  { %v116_v24 = vmul.f32 1.442695, %v115_v23 }
 0x1db   :  { %150 = vpow2.f32 %v116_v24 }
 0x1dc   :  { %152 = vpow2.f32 %v106_v27 }
 0x1e8   :  { %v151_v25 = vpop.eup %150 }
 0x1e9   :  { %v118_v26 = vsel %vm100_vm6, %v151_v25, 0.0  ;;  %v153_v28 = vpop.eup %152 }
 0x1ea   :  { %119 = vadd.xlane.f32.xlu1 %v118_v26  ;;  %v109_v30 = vmul.f32 %v153_v28, %v108_v29 }
 0x273   :  { %v120_v31 = vpop.xlane.xlu1 %119 }
 0x274   :  { %v121_v32 = vadd.f32 %v120_v31, %v109_v30 }
 0x276   :  { %123 = vst.msk [vmem:[%s226_s5] sm:$0xff] %vm25_vm0, %v121_v32 }

// kernel: ultron_training_loss.5
= control target key start
LH: loop header
LB: loop body
LE: loop exit
PB: predicated region body
PF: predicated region fallthrough
CT: control target
= control target key end

     0   :  { %vm22_vm0 = vcmask 7168   ;;  %vm41_vm1 = vcmask 130048   ;;  %v171_v0 = vmov 0.0   ;;  %vm172_vm2 = vmmov 0   ;;  %s227_s1 = inlined_call_operand.vmem [shape: bf16[16,16], index: 1, kind: input, shape index: {}]   ;;  %s228_s3 = inlined_call_operand.vmem [shape: s32[8,1], index: 3, kind: input, shape index: {}]   ;;  %s229_s0 = inlined_call_operand.vmem [shape: bf16[8,16], index: 0, kind: input, shape index: {}]   ;;  %s230_s2 = inlined_call_operand.vmem [shape: f32[1,16], index: 2, kind: input, shape index: {}]   ;;  %s231_s4 = inlined_call_operand.vmem [shape: f32[8,1], index: 4, kind: output, shape index: {}]  }
   0x1   :  { %24 = vst.msk [vmem:[#allocation3] sm:$0xff] %vm22_vm0, %v171_v0  ;;  %25 = vst.msk [vmem:[#allocation4] sm:$0xff] %vm22_vm0, %v171_v0  ;;  %152 = vmatprep.subr.bf16.mxu0 %v171_v0  ;;  %v164_v1 = vld [vmem:[%s227_s1] sm:$0xff]   ;;  %154 = vmatprep.mubr.msk.bf16.mxu0 %vm172_vm2, %v171_v0  ;;  %v173_v2 = vmov 0   ;;  %v174_v6 = vmov -1e+30   ;;  %v88_v7 = vlaneseq }
   0x2   :  { %163 = vset.pattern.permute.xlu1 %v173_v2  ;;  %v94_v3 = vld [vmem:[%s228_s3] sm:$0xff]  ;;  %162 = vset.pattern.permute.xlu0 %v173_v2  ;;  %v46_v4 = vsel %vm41_vm1, %v164_v1, 0  ;;  %23 = vst.msk [vmem:[#allocation2] sm:$0xff] %vm22_vm0, %v174_v6 }
   0x3   :  { %96 = vperm.xlu1 %163, %v94_v3   ;;  %153 = vmatpush3.bf16.xpose.msra.mxu0 %v46_v4  ;;  %v26_v5 = vld [vmem:[%s229_s0] sm:$0xf]  ;;  %v89_v8 = vand.u32 127, %v88_v7 }
   0x4   :  { %v147_v10 = vld [vmem:[%s230_s2] ss:$0 sm:$0xff] }
   0x5   :  { %vm93_vm4 = vcmp.lt.s32.totalorder %v89_v8, 16 }
   0x8   :  { %v108_v31 = vld [vmem:[#allocation3] sm:$0xff]  ;;  %v125_v35 = vld [vmem:[#allocation4] sm:$0xff] }
   0x9   :  { %v100_v19 = vld [vmem:[#allocation2] sm:$0xff] }
   0xa   :  { %155 = vmatmul.mubr.msk.bf16.vlgmr.msra.gmra.mxu0 %vm41_vm1, %v26_v5 }
  0x7e   :  { %v97_v9 = vpop.permute.xlu1 %96 }
  0x7f   :  { %vm98_vm3 = vcmp.eq.s32.totalorder %v89_v8, %v97_v9 }
  0xca   :  { %v82_v11 = vpop.f32.mrf.mxu0 }
  0xcb   :  { %v83_v12 = vadd.f32 %v147_v10, %v82_v11 }
  0xcc   :  { %v156_v13 = vpop.f32.mrf.mxu0 }
  0xcd   :  { %v99_v14 = vsel %vm93_vm4, %v83_v12, -1e+30  ;;  %v126_v15 = vsel %vm98_vm3, %v83_v12, 0.0 }
  0xce   :  { %v85_v16 = vpop.f32.mrf.mxu0  ;;  %v101_v17 = vsel %vm41_vm1, %v99_v14, -inf  ;;  %v127_v28 = vsel %vm41_vm1, %v126_v15, 0.0 }
  0xcf   :  { %102 = vmax.xlane.f32.xlu0 %v101_v17 }
  0xd0   :  { %v157_v18 = vpop.f32.mrf.mxu0 }
 0x158   :  { %v103_v20 = vpop.xlane.xlu0 %102 }
 0x159   :  { %v104_v21 = vmax.f32 %v100_v19, %v103_v20 }
 0x15b   :  { %v105_v22 = vsub.f32 %v100_v19, %v104_v21  ;;  %124 = vst.msk [vmem:[#allocation2] sm:$0xff] %vm22_vm0, %v104_v21  ;;  %112 = vperm.xlu0 %162, %v104_v21  }
 0x15d   :  { %v106_v29 = vmul.f32 1.442695, %v105_v22 }
 0x162   :  { %v135_v41 = vld [vmem:[#allocation2] sm:$0xff] }
 0x1d6   :  { %v113_v23 = vpop.permute.xlu0 %112 }
 0x1d7   :  { %v115_v24 = vsub.f32 %v99_v14, %v113_v23 }
 0x1d9   :  { %v116_v25 = vmul.f32 1.442695, %v115_v24 }
 0x1db   :  { %165 = vpow2.f32 %v116_v25 }
 0x1dc   :  { %167 = vpow2.f32 %v106_v29 }
 0x1e8   :  { %v166_v26 = vpop.eup %165 }
 0x1e9   :  { %v118_v27 = vsel %vm41_vm1, %v166_v26, 0.0  ;;  %v168_v30 = vpop.eup %167 }
 0x1ea   :  { %119 = vadd.xlane.f32.xlu1 %v118_v27  ;;  %v109_v32 = vmul.f32 %v168_v30, %v108_v31 }
 0x1ee   :  { %128 = vadd.xlane.f32.xlu1 %v127_v28 }
 0x273   :  { %v120_v33 = vpop.xlane.xlu1 %119 }
 0x274   :  { %v121_v34 = vadd.f32 %v120_v33, %v109_v32 }
 0x276   :  { %123 = vst.msk [vmem:[#allocation3] sm:$0xff] %vm22_vm0, %v121_v34 }
 0x277   :  { %v129_v36 = vpop.xlane.xlu1 %128 }
 0x278   :  { %v130_v37 = vadd.f32 %v129_v36, %v125_v35 }
 0x27a   :  { %131 = vst.msk [vmem:[#allocation4] sm:$0xff] %vm22_vm0, %v130_v37 }
 0x27d   :  { %v136_v38 = vld [vmem:[#allocation3] sm:$0xff] }
 0x27e   :  { %169 = vlog2.f32 %v136_v38 }
 0x281   :  { %v140_v43 = vld [vmem:[#allocation4] sm:$0xff] }
 0x28b   :  { %v170_v39 = vpop.eup %169 }
 0x28c   :  { %v138_v40 = vmul.f32 0.6931472, %v170_v39 }
 0x28e   :  { %v139_v42 = vadd.f32 %v138_v40, %v135_v41 }
 0x290   :  { %v141_v44 = vsub.f32 %v139_v42, %v140_v43 }
 0x292   :  { %142 = vst.msk [vmem:[%s231_s4] sm:$0xff] %vm22_vm0, %v141_v44 }

</bundles_post_ra>
